<compile_context>
chip_gen: v7x
topology: tpu7x:2x2x1
jax: 0.10.0
libtpu: 0.0.40
codegen_flags: <defaults>
</compile_context>

<pallas_src>
import jax
import jax.numpy as jnp
import numpy as np
from jax.experimental import pallas as pl
from jax.experimental.pallas import tpu as pltpu

# --- model sizes (small, consistent with the module's forward) -------------------------
EMSIZE = 32      # args.emsize
NHID = 32        # args.nhid  (== attention size)
VOCAB = 64       # args.tgt_vocab_size
CODE_LEN = 16    # src_len == code_len
RE_ACT = 8       # re_act_size (word / argument input length)
BATCH = 2

# TODO(synk): nn.GRU dropout_rnn is a no-op for a single-layer GRU (and inference), so it
#             is intentionally not modeled.


# --- in-kernel helpers ------------------------------------------------------------------
def _attention(values, bcast, wfc, wv_row):
    """One Attention head, batched over the BB batch rows (no per-b unrolling).

    Attention.fc is bias-free, so sum(fc(stack(s))) == fc(sum(s)); the caller passes the
    per-timestep tensor (`values`) and the per-batch broadcast part (`bcast`) separately.
      values: (BB, T, D)   bcast: (BB, D)   wfc: (D, A)   wv_row: (1, A)
    returns softmax_T(fc2(tanh(fc(values + bcast)))) @ values, shape (BB, D).
    """
    BB, T, D = values.shape
    A = wfc.shape[1]
    # one fused (BB*T, D) @ (D, A) MXU matmul for the whole batch block
    x2 = (values + bcast[:, None, :]).reshape(BB * T, D)
    y = jnp.tanh(jnp.dot(x2, wfc, preferred_element_type=jnp.float32))       # (BB*T, A)
    # logits via VPU multiply + lane reduce (no 1-lane-wide MXU pass)
    logits = jnp.sum(y.reshape(BB, T, A) * wv_row[None, :, :],
                     axis=2, keepdims=True)                                   # (BB, T, 1)
    m = jnp.max(logits, axis=1, keepdims=True)                                # (BB, 1, 1)
    p = jnp.exp(logits - m)                                                   # (BB, T, 1)
    # defer normalization: weighted sum first, one reciprocal multiply at the end
    num = jnp.sum(p * values, axis=1)                                         # (BB, D)
    den = jnp.sum(p, axis=1)                                                  # (BB, 1)
    return num * pl.reciprocal(den, approx=False)                             # (BB, D)


# --- the kernel (whole batch block per grid step) ---------------------------------------
def _double_decoder_kernel(ds_ref, enc_ref, wa_ref, wattn_ref, wgru_ref, wout_ref, out_ref):
    f32 = jnp.float32
    E2H = ds_ref.shape[1]
    BB = ds_ref.shape[0]
    H = enc_ref.shape[2]
    E = E2H - 2 * H
    R = wa_ref.shape[1] // 2
    V = wout_ref.shape[1]
    In = E + 3 * H                     # GRU input size
    Fin = 5 * H + E                    # fc input size

    # packed per-batch data: [dec | s0 | s1]
    ds = ds_ref[...]                   # (BB, E+2H)
    dec = ds[:, 0:E]                   # decoder_input[:, 0, :]
    s_cat = ds[:, E:E + 2 * H]         # [s[0] | s[1]]
    s1 = ds[:, E + H:E + 2 * H]        # s[-1]
    enc = enc_ref[...]                 # (BB, L, H)
    word = wa_ref[:, 0:R, :]           # (BB, R, E)   sublane slice (R multiple of 8)
    arg = wa_ref[:, R:2 * R, :]        # (BB, R, E)

    # attention weights: fc heads sublane-stacked, fc2 rows appended
    wfc_ed = wattn_ref[0:E, :]
    wfc_w = wattn_ref[E:2 * E, :]
    wfc_a = wattn_ref[2 * E:3 * E, :]
    wv_ed = wattn_ref[3 * E:3 * E + 1, :]
    wv_w = wattn_ref[3 * E + 1:3 * E + 2, :]
    wv_a = wattn_ref[3 * E + 2:3 * E + 3, :]

    # three sequentially-dependent attention heads (running sum hoisted for head 3)
    enc_dec = _attention(enc, s1 + dec, wfc_ed, wv_ed)                  # (BB, H)
    base = dec + enc_dec
    word_out = _attention(word, base, wfc_w, wv_w)                      # (BB, E)
    arg_out = _attention(arg, base + word_out, wfc_a, wv_a)             # (BB, E)

    # bidirectional GRU over the length-1 decoder sequence, both directions fused.
    # x @ W_ih split into per-segment partial matmuls (no lane-concat of x):
    #   x = [enc_dec | word_out | arg_out | dec], W_ih cols [r_f r_b z_f z_b n_f n_b]
    g0, g1, g2, g3 = 0, H, H + E, H + 2 * E
    b_ih = wgru_ref[In + 2 * H:In + 2 * H + 1, :]                       # (1, 6H)
    b_hh = wgru_ref[In + 2 * H + 1:In + 2 * H + 2, :]                   # (1, 6H)
    i_all = (jnp.dot(enc_dec, wgru_ref[g0:g1, :], preferred_element_type=f32)
             + jnp.dot(word_out, wgru_ref[g1:g2, :], preferred_element_type=f32)
             + jnp.dot(arg_out, wgru_ref[g2:g3, :], preferred_element_type=f32)
             + jnp.dot(dec, wgru_ref[g3:In, :], preferred_element_type=f32)
             + b_ih)                                                    # (BB, 6H)
    h_all = (jnp.dot(s_cat, wgru_ref[In:In + 2 * H, :], preferred_element_type=f32)
             + b_hh)                                                    # (BB, 6H)
    rz = jax.nn.sigmoid(i_all[:, 0:4 * H] + h_all[:, 0:4 * H])
    r = rz[:, 0:2 * H]
    z = rz[:, 2 * H:4 * H]
    n = jnp.tanh(i_all[:, 4 * H:6 * H] + r * h_all[:, 4 * H:6 * H])
    h_new = (1.0 - z) * n + z * s_cat                                   # (BB, 2H) = [h_f|h_b]

    # output projection (PyTorch cat order: output, enc_dec, word, argument, decoder_input)
    # also split into per-segment partial matmuls + folded bias row.
    p0, p1, p2, p3, p4 = 0, 2 * H, 3 * H, 3 * H + E, 3 * H + 2 * E
    bo = wout_ref[Fin:Fin + 1, :]                                       # (1, V)
    pred = (jnp.dot(h_new, wout_ref[p0:p1, :], preferred_element_type=f32)
            + jnp.dot(enc_dec, wout_ref[p1:p2, :], preferred_element_type=f32)
            + jnp.dot(word_out, wout_ref[p2:p3, :], preferred_element_type=f32)
            + jnp.dot(arg_out, wout_ref[p3:p4, :], preferred_element_type=f32)
            + jnp.dot(dec, wout_ref[p4:Fin, :], preferred_element_type=f32)
            + bo)                                                       # (BB, V)

    # single lane-dense output slab: [pred | h_f | h_b | zero-pad]
    slab = jnp.concatenate([pred, h_new], axis=1)
    pad = out_ref.shape[1] - (V + 2 * H)
    if pad:
        slab = jnp.concatenate([slab, jnp.zeros((BB, pad), f32)], axis=1)
    out_ref[...] = slab


# --- host-side weight packing (6 slabs total -> 6 input streams incl. data) -------------
def _pack_params(P):
    H = P["whh_f"].shape[2]

    # attention: fc weights stacked along sublanes (one head per E-row block), then the
    # three fc2 rows appended -> (3E+3, A)
    w_attn = jnp.concatenate(
        [P["wfc_ed"], P["wfc_w"], P["wfc_a"],
         P["wv_ed"].T, P["wv_w"].T, P["wv_a"].T], axis=0)

    def gate_cols(wf, wb):   # (3, M, H) x2 -> (M, 6H), cols [r_f r_b z_f z_b n_f n_b]
        return jnp.concatenate([wf[0], wb[0], wf[1], wb[1], wf[2], wb[2]], axis=1)

    w_ih = gate_cols(P["wih_f"], P["wih_b"])                                    # (In, 6H)
    zh = jnp.zeros((H, H), P["whh_f"].dtype)
    w_hh_f = jnp.concatenate([P["whh_f"][0], zh, P["whh_f"][1], zh, P["whh_f"][2], zh], axis=1)
    w_hh_b = jnp.concatenate([zh, P["whh_b"][0], zh, P["whh_b"][1], zh, P["whh_b"][2]], axis=1)
    b_ih = gate_cols(P["bih_f"], P["bih_b"])                                    # (1, 6H)
    b_hh = gate_cols(P["bhh_f"], P["bhh_b"])                                    # (1, 6H)
    # GRU slab: [W_ih ; W_hh_fwd ; W_hh_bwd ; b_ih ; b_hh] -> (In+2H+2, 6H)
    w_gru = jnp.concatenate([w_ih, w_hh_f, w_hh_b, b_ih, b_hh], axis=0)
    # output slab: [W_out ; b_out] -> (Fin+1, V)
    w_out = jnp.concatenate([P["wfc_o"], P["bfc_o"]], axis=0)
    return w_attn, w_gru, w_out


# --- wrapper ----------------------------------------------------------------------------
def double_decoder_forward(dec, s, enc, word, arg, params, *, batch_block=None):
    """batch_block=None (default) processes the whole batch in one grid step; this is the
    right choice at small B on v5e/v6e AND v7x (splitting B=2 across v7x's two cores only
    duplicates the weight fetch and adds a grid step).  If B is ever scaled up by orders
    of magnitude, pick batch_block as a multiple of 8 such that (a) the per-step block
    fits the default scoped VMEM (16 MiB v5e / 32 MiB v6e,v7x; double-buffered) and
    (b) there are >=2-4 grid steps per core so BlockSpec pipelining overlaps DMA with
    compute; raise vmem_limit_bytes via pltpu.CompilerParams only if deliberately
    exceeding the default."""
    B, _, E = dec.shape
    L, H = enc.shape[1], enc.shape[2]
    R = word.shape[1]
    V = params["bfc_o"].shape[1]

    # load-bearing assumptions of the kernel rewrite (see module docstring):
    assert E == H, "DoubleDecoder implicitly requires emsize == nhid"
    # Attention.fc is bias-free by construction (no bias parameter exists in `params`).

    BB = B if batch_block is None else batch_block
    assert B % BB == 0 and (BB == B or BB % 8 == 0), (B, BB)
    slab_w = pl.cdiv(V + 2 * H, 128) * 128      # lane-dense output slab width

    # pack per-batch data: [dec | s0 | s1] and [word ; arg]
    dec_s = jnp.concatenate([dec[:, 0, :], s[0], s[1]], axis=1)     # (B, E+2H)
    wa = jnp.concatenate([word, arg], axis=1)                       # (B, 2R, E)
    packed = _pack_params(params)

    data = [dec_s, enc, wa]
    data_specs = [
        pl.BlockSpec((BB, E + 2 * H), lambda i: (i, 0)),
        pl.BlockSpec((BB, L, H), lambda i: (i, 0, 0)),
        pl.BlockSpec((BB, 2 * R, E), lambda i: (i, 0, 0)),
    ]
    weight_specs = [pl.BlockSpec(w.shape, lambda i: (0, 0)) for w in packed]

    slab = pl.pallas_call(
        _double_decoder_kernel,
        out_shape=jax.ShapeDtypeStruct((B, slab_w), jnp.float32),
        grid=(B // BB,),
        in_specs=data_specs + weight_specs,
        out_specs=pl.BlockSpec((BB, slab_w), lambda i: (i, 0)),
        compiler_params=pltpu.CompilerParams(dimension_semantics=("parallel",)),
    )(*data, *packed)

    pred = slab[:, :V]                                   # (B, V)
    h_new = slab[:, V:V + 2 * H]                         # (B, 2H) = [h_f | h_b]
    h_n = jnp.stack([h_new[:, :H], h_new[:, H:2 * H]], axis=0)   # (2, B, H)
    return pred, h_n


# --- deterministic parameter init (shapes from DoubleDecoder.__init__, non-seq2seq) -----
def init_params(key):
    E, H, A, V = EMSIZE, NHID, NHID, VOCAB
    in_sz = E + 3 * H          # GRU input size
    fin = 5 * H + E            # fc input size
    ks = jax.random.split(key, 16)

    def w(k, shape, scale=0.1):
        return (scale * jax.random.normal(k, shape)).astype(jnp.float32)

    return {
        "wfc_ed": w(ks[0], (E, A)), "wv_ed": w(ks[1], (A, 1)),
        "wfc_w": w(ks[2], (E, A)), "wv_w": w(ks[3], (A, 1)),
        "wfc_a": w(ks[4], (E, A)), "wv_a": w(ks[5], (A, 1)),
        "wih_f": w(ks[6], (3, in_sz, H)), "whh_f": w(ks[7], (3, H, H)),
        "bih_f": w(ks[8], (3, 1, H)), "bhh_f": w(ks[9], (3, 1, H)),
        "wih_b": w(ks[10], (3, in_sz, H)), "whh_b": w(ks[11], (3, H, H)),
        "bih_b": w(ks[12], (3, 1, H)), "bhh_b": w(ks[13], (3, 1, H)),
        "wfc_o": w(ks[14], (fin, V)), "bfc_o": w(ks[15], (1, V)),
    }


# --- pure-JAX reference (mirrors the PyTorch forward semantics; HIGHEST precision) ------
def reference(dec, s, enc, word, arg, P):
    hp = jax.lax.Precision.HIGHEST

    def attn(xsum, values, wfc, wv):
        y = jnp.tanh(jnp.einsum("btd,da->bta", xsum, wfc, precision=hp))
        logits = jnp.einsum("bta,ao->bt", y, wv, precision=hp)
        w = jax.nn.softmax(logits, axis=1)
        return jnp.einsum("bt,bth->bh", w, values, precision=hp)[:, None, :]

    s_last = s[1][:, None, :]
    ed = attn(s_last + enc + dec, enc, P["wfc_ed"], P["wv_ed"])
    wo = attn(word + dec + ed, word, P["wfc_w"], P["wv_w"])
    ao = attn(arg + dec + ed + wo, arg, P["wfc_a"], P["wv_a"])
    x = jnp.concatenate([ed, wo, ao, dec], axis=2)[:, 0, :]

    def gru(x, h, wih, whh, bih, bhh):
        dot = lambda a, b: jnp.dot(a, b, precision=hp)
        ir = dot(x, wih[0]) + bih[0]
        iz = dot(x, wih[1]) + bih[1]
        in_ = dot(x, wih[2]) + bih[2]
        hr = dot(h, whh[0]) + bhh[0]
        hz = dot(h, whh[1]) + bhh[1]
        hn = dot(h, whh[2]) + bhh[2]
        r = jax.nn.sigmoid(ir + hr)
        z = jax.nn.sigmoid(iz + hz)
        n = jnp.tanh(in_ + r * hn)
        return (1.0 - z) * n + z * h

    h_f = gru(x, s[0], P["wih_f"], P["whh_f"], P["bih_f"], P["bhh_f"])
    h_b = gru(x, s[1], P["wih_b"], P["whh_b"], P["bih_b"], P["bhh_b"])
    out = jnp.concatenate([h_f, h_b], axis=1)
    feat = jnp.concatenate([out, ed[:, 0], wo[:, 0], ao[:, 0], dec[:, 0]], axis=1)
    pred = jnp.dot(feat, P["wfc_o"], precision=hp) + P["bfc_o"]
    h_n = jnp.stack([h_f, h_b], axis=0)
    return pred, h_n


if __name__ == "__main__":
    key = jax.random.PRNGKey(0)
    kd, ks_, ke, kw, ka, kp = jax.random.split(key, 6)
    dec = jax.random.normal(kd, (BATCH, 1, EMSIZE), dtype=jnp.float32)
    s = jax.random.normal(ks_, (2, BATCH, NHID), dtype=jnp.float32)
    enc = jax.random.normal(ke, (BATCH, CODE_LEN, NHID), dtype=jnp.float32)
    word = jax.random.normal(kw, (BATCH, RE_ACT, EMSIZE), dtype=jnp.float32)
    arg = jax.random.normal(ka, (BATCH, RE_ACT, EMSIZE), dtype=jnp.float32)
    P = init_params(kp)

    pred, h_n = double_decoder_forward(dec, s, enc, word, arg, P)
    jax.block_until_ready((pred, h_n))

    assert pred.shape == (BATCH, VOCAB), pred.shape
    assert h_n.shape == (2, BATCH, NHID), h_n.shape

    # kernel matmuls run at default (bf16 MXU) precision; reference is HIGHEST, so the
    # tolerance is loosened from 1e-4 accordingly.
    pred_ref, hn_ref = reference(dec, s, enc, word, arg, P)
    np.testing.assert_allclose(np.asarray(pred), np.asarray(pred_ref), rtol=2e-2, atol=2e-2)
    np.testing.assert_allclose(np.asarray(h_n), np.asarray(hn_ref), rtol=2e-2, atol=2e-2)

    print("KERNEL_OK")
</pallas_src>

<mosaic_0001>
module attributes {stable_mosaic.version = 11 : i64} {
  func.func @_double_decoder_kernel(%arg0: i32, %arg1: memref<2x96xf32, #tpu.memory_space<vmem>>, %arg2: memref<2x16x32xf32, #tpu.memory_space<vmem>>, %arg3: memref<2x16x32xf32, #tpu.memory_space<vmem>>, %arg4: memref<99x32xf32, #tpu.memory_space<vmem>>, %arg5: memref<194x192xf32, #tpu.memory_space<vmem>>, %arg6: memref<193x64xf32, #tpu.memory_space<vmem>>, %arg7: memref<2x128xf32, #tpu.memory_space<vmem>>) attributes {dimension_semantics = [#tpu.dimension_semantics<parallel>], iteration_bounds = array<i64: 1>, scalar_prefetch = 0 : i64, scratch_operands = 0 : i64, tpu.core_type = #tpu.core_type<tc>, window_params = [{transform_indices = @transform_0, window_bounds = array<i64: 2, 96>}, {transform_indices = @transform_1, window_bounds = array<i64: 2, 16, 32>}, {transform_indices = @transform_2, window_bounds = array<i64: 2, 16, 32>}, {pipeline_mode = #tpu.pipeline_mode<synchronous>, transform_indices = @transform_3, window_bounds = array<i64: 99, 32>}, {pipeline_mode = #tpu.pipeline_mode<synchronous>, transform_indices = @transform_4, window_bounds = array<i64: 194, 192>}, {pipeline_mode = #tpu.pipeline_mode<synchronous>, transform_indices = @transform_5, window_bounds = array<i64: 193, 64>}, {transform_indices = @transform_6, window_bounds = array<i64: 2, 128>}]} {
    %c0 = arith.constant 0 : index
    %c0_0 = arith.constant 0 : index
    %0 = vector.load %arg1[%c0, %c0_0] : memref<2x96xf32, #tpu.memory_space<vmem>>, vector<2x96xf32>
    %1 = vector.extract_strided_slice %0 {offsets = [0, 0], sizes = [2, 32], strides = [1, 1]} : vector<2x96xf32> to vector<2x32xf32>
    %2 = vector.extract_strided_slice %0 {offsets = [0, 32], sizes = [2, 64], strides = [1, 1]} : vector<2x96xf32> to vector<2x64xf32>
    %3 = vector.extract_strided_slice %0 {offsets = [0, 64], sizes = [2, 32], strides = [1, 1]} : vector<2x96xf32> to vector<2x32xf32>
    %c0_1 = arith.constant 0 : index
    %c0_2 = arith.constant 0 : index
    %c0_3 = arith.constant 0 : index
    %4 = vector.load %arg2[%c0_1, %c0_2, %c0_3] : memref<2x16x32xf32, #tpu.memory_space<vmem>>, vector<2x16x32xf32>
    %c0_4 = arith.constant 0 : index
    %c0_5 = arith.constant 0 : index
    %c0_6 = arith.constant 0 : index
    %5 = vector.load %arg3[%c0_4, %c0_5, %c0_6] : memref<2x16x32xf32, #tpu.memory_space<vmem>>, vector<2x8x32xf32>
    %c0_7 = arith.constant 0 : index
    %c8 = arith.constant 8 : index
    %c0_8 = arith.constant 0 : index
    %6 = vector.load %arg3[%c0_7, %c8, %c0_8] : memref<2x16x32xf32, #tpu.memory_space<vmem>>, vector<2x8x32xf32>
    %c0_9 = arith.constant 0 : index
    %c0_10 = arith.constant 0 : index
    %7 = vector.load %arg4[%c0_9, %c0_10] : memref<99x32xf32, #tpu.memory_space<vmem>>, vector<32x32xf32>
    %c32 = arith.constant 32 : index
    %c0_11 = arith.constant 0 : index
    %8 = vector.load %arg4[%c32, %c0_11] : memref<99x32xf32, #tpu.memory_space<vmem>>, vector<32x32xf32>
    %c64 = arith.constant 64 : index
    %c0_12 = arith.constant 0 : index
    %9 = vector.load %arg4[%c64, %c0_12] : memref<99x32xf32, #tpu.memory_space<vmem>>, vector<32x32xf32>
    %c96 = arith.constant 96 : index
    %c0_13 = arith.constant 0 : index
    %10 = vector.load %arg4[%c96, %c0_13] : memref<99x32xf32, #tpu.memory_space<vmem>>, vector<1x32xf32>
    %c97 = arith.constant 97 : index
    %c0_14 = arith.constant 0 : index
    %11 = vector.load %arg4[%c97, %c0_14] : memref<99x32xf32, #tpu.memory_space<vmem>>, vector<1x32xf32>
    %c98 = arith.constant 98 : index
    %c0_15 = arith.constant 0 : index
    %12 = vector.load %arg4[%c98, %c0_15] : memref<99x32xf32, #tpu.memory_space<vmem>>, vector<1x32xf32>
    %13 = arith.addf %3, %1 : vector<2x32xf32>
    %14 = vector.shape_cast %13 : vector<2x32xf32> to vector<2x1x32xf32>
    %15 = vector.broadcast %14 : vector<2x1x32xf32> to vector<2x16x32xf32>
    %16 = arith.addf %4, %15 : vector<2x16x32xf32>
    %17 = vector.shape_cast %16 : vector<2x16x32xf32> to vector<32x32xf32>
    %cst = arith.constant dense<0.000000e+00> : vector<32x32xf32>
    %18 = tpu.matmul %17, %7, %cst {dimension_numbers = #tpu.dot_dimension_numbers<[1], [0], [0], [1], [0, 0, 1, 1], [], []>} : vector<32x32xf32>, vector<32x32xf32>, vector<32x32xf32> -> vector<32x32xf32>
    %19 = math.tanh %18 : vector<32x32xf32>
    %20 = vector.shape_cast %19 : vector<32x32xf32> to vector<2x16x32xf32>
    %21 = vector.shape_cast %10 : vector<1x32xf32> to vector<1x1x32xf32>
    %22 = vector.broadcast %21 : vector<1x1x32xf32> to vector<2x16x32xf32>
    %23 = arith.mulf %20, %22 : vector<2x16x32xf32>
    %cst_16 = arith.constant dense<0.000000e+00> : vector<2x16xf32>
    %24 = vector.multi_reduction <add>, %23, %cst_16 [2] : vector<2x16x32xf32> to vector<2x16xf32>
    %25 = vector.shape_cast %24 : vector<2x16xf32> to vector<2x16x1xf32>
    %cst_17 = arith.constant dense<0xFF800000> : vector<2x1xf32>
    %26 = vector.multi_reduction <maximumf>, %25, %cst_17 [1] : vector<2x16x1xf32> to vector<2x1xf32>
    %27 = vector.shape_cast %26 : vector<2x1xf32> to vector<2x1x1xf32>
    %28 = vector.broadcast %27 : vector<2x1x1xf32> to vector<2x16x1xf32>
    %29 = arith.subf %25, %28 : vector<2x16x1xf32>
    %30 = math.exp %29 : vector<2x16x1xf32>
    %31 = vector.broadcast %30 : vector<2x16x1xf32> to vector<2x16x32xf32>
    %32 = arith.mulf %31, %4 : vector<2x16x32xf32>
    %cst_18 = arith.constant dense<0.000000e+00> : vector<2x32xf32>
    %33 = vector.multi_reduction <add>, %32, %cst_18 [1] : vector<2x16x32xf32> to vector<2x32xf32>
    %cst_19 = arith.constant dense<0.000000e+00> : vector<2x1xf32>
    %34 = vector.multi_reduction <add>, %30, %cst_19 [1] : vector<2x16x1xf32> to vector<2x1xf32>
    %35 = tpu.reciprocal %34 : vector<2x1xf32> -> vector<2x1xf32>
    %36 = vector.broadcast %35 : vector<2x1xf32> to vector<2x32xf32>
    %37 = arith.mulf %33, %36 : vector<2x32xf32>
    %38 = arith.addf %1, %37 : vector<2x32xf32>
    %39 = vector.shape_cast %38 : vector<2x32xf32> to vector<2x1x32xf32>
    %40 = vector.broadcast %39 : vector<2x1x32xf32> to vector<2x8x32xf32>
    %41 = arith.addf %5, %40 : vector<2x8x32xf32>
    %42 = vector.shape_cast %41 : vector<2x8x32xf32> to vector<16x32xf32>
    %cst_20 = arith.constant dense<0.000000e+00> : vector<16x32xf32>
    %43 = tpu.matmul %42, %8, %cst_20 {dimension_numbers = #tpu.dot_dimension_numbers<[1], [0], [0], [1], [0, 0, 1, 1], [], []>} : vector<16x32xf32>, vector<32x32xf32>, vector<16x32xf32> -> vector<16x32xf32>
    %44 = math.tanh %43 : vector<16x32xf32>
    %45 = vector.shape_cast %44 : vector<16x32xf32> to vector<2x8x32xf32>
    %46 = vector.shape_cast %11 : vector<1x32xf32> to vector<1x1x32xf32>
    %47 = vector.broadcast %46 : vector<1x1x32xf32> to vector<2x8x32xf32>
    %48 = arith.mulf %45, %47 : vector<2x8x32xf32>
    %cst_21 = arith.constant dense<0.000000e+00> : vector<2x8xf32>
    %49 = vector.multi_reduction <add>, %48, %cst_21 [2] : vector<2x8x32xf32> to vector<2x8xf32>
    %50 = vector.shape_cast %49 : vector<2x8xf32> to vector<2x8x1xf32>
    %cst_22 = arith.constant dense<0xFF800000> : vector<2x1xf32>
    %51 = vector.multi_reduction <maximumf>, %50, %cst_22 [1] : vector<2x8x1xf32> to vector<2x1xf32>
    %52 = vector.shape_cast %51 : vector<2x1xf32> to vector<2x1x1xf32>
    %53 = vector.broadcast %52 : vector<2x1x1xf32> to vector<2x8x1xf32>
    %54 = arith.subf %50, %53 : vector<2x8x1xf32>
    %55 = math.exp %54 : vector<2x8x1xf32>
    %56 = vector.broadcast %55 : vector<2x8x1xf32> to vector<2x8x32xf32>
    %57 = arith.mulf %56, %5 : vector<2x8x32xf32>
    %cst_23 = arith.constant dense<0.000000e+00> : vector<2x32xf32>
    %58 = vector.multi_reduction <add>, %57, %cst_23 [1] : vector<2x8x32xf32> to vector<2x32xf32>
    %cst_24 = arith.constant dense<0.000000e+00> : vector<2x1xf32>
    %59 = vector.multi_reduction <add>, %55, %cst_24 [1] : vector<2x8x1xf32> to vector<2x1xf32>
    %60 = tpu.reciprocal %59 : vector<2x1xf32> -> vector<2x1xf32>
    %61 = vector.broadcast %60 : vector<2x1xf32> to vector<2x32xf32>
    %62 = arith.mulf %58, %61 : vector<2x32xf32>
    %63 = arith.addf %38, %62 : vector<2x32xf32>
    %64 = vector.shape_cast %63 : vector<2x32xf32> to vector<2x1x32xf32>
    %65 = vector.broadcast %64 : vector<2x1x32xf32> to vector<2x8x32xf32>
    %66 = arith.addf %6, %65 : vector<2x8x32xf32>
    %67 = vector.shape_cast %66 : vector<2x8x32xf32> to vector<16x32xf32>
    %cst_25 = arith.constant dense<0.000000e+00> : vector<16x32xf32>
    %68 = tpu.matmul %67, %9, %cst_25 {dimension_numbers = #tpu.dot_dimension_numbers<[1], [0], [0], [1], [0, 0, 1, 1], [], []>} : vector<16x32xf32>, vector<32x32xf32>, vector<16x32xf32> -> vector<16x32xf32>
    %69 = math.tanh %68 : vector<16x32xf32>
    %70 = vector.shape_cast %69 : vector<16x32xf32> to vector<2x8x32xf32>
    %71 = vector.shape_cast %12 : vector<1x32xf32> to vector<1x1x32xf32>
    %72 = vector.broadcast %71 : vector<1x1x32xf32> to vector<2x8x32xf32>
    %73 = arith.mulf %70, %72 : vector<2x8x32xf32>
    %cst_26 = arith.constant dense<0.000000e+00> : vector<2x8xf32>
    %74 = vector.multi_reduction <add>, %73, %cst_26 [2] : vector<2x8x32xf32> to vector<2x8xf32>
    %75 = vector.shape_cast %74 : vector<2x8xf32> to vector<2x8x1xf32>
    %cst_27 = arith.constant dense<0xFF800000> : vector<2x1xf32>
    %76 = vector.multi_reduction <maximumf>, %75, %cst_27 [1] : vector<2x8x1xf32> to vector<2x1xf32>
    %77 = vector.shape_cast %76 : vector<2x1xf32> to vector<2x1x1xf32>
    %78 = vector.broadcast %77 : vector<2x1x1xf32> to vector<2x8x1xf32>
    %79 = arith.subf %75, %78 : vector<2x8x1xf32>
    %80 = math.exp %79 : vector<2x8x1xf32>
    %81 = vector.broadcast %80 : vector<2x8x1xf32> to vector<2x8x32xf32>
    %82 = arith.mulf %81, %6 : vector<2x8x32xf32>
    %cst_28 = arith.constant dense<0.000000e+00> : vector<2x32xf32>
    %83 = vector.multi_reduction <add>, %82, %cst_28 [1] : vector<2x8x32xf32> to vector<2x32xf32>
    %cst_29 = arith.constant dense<0.000000e+00> : vector<2x1xf32>
    %84 = vector.multi_reduction <add>, %80, %cst_29 [1] : vector<2x8x1xf32> to vector<2x1xf32>
    %85 = tpu.reciprocal %84 : vector<2x1xf32> -> vector<2x1xf32>
    %86 = vector.broadcast %85 : vector<2x1xf32> to vector<2x32xf32>
    %87 = arith.mulf %83, %86 : vector<2x32xf32>
    %c192 = arith.constant 192 : index
    %c0_30 = arith.constant 0 : index
    %88 = vector.load %arg5[%c192, %c0_30] : memref<194x192xf32, #tpu.memory_space<vmem>>, vector<1x192xf32>
    %c193 = arith.constant 193 : index
    %c0_31 = arith.constant 0 : index
    %89 = vector.load %arg5[%c193, %c0_31] : memref<194x192xf32, #tpu.memory_space<vmem>>, vector<1x192xf32>
    %c0_32 = arith.constant 0 : index
    %c0_33 = arith.constant 0 : index
    %90 = vector.load %arg5[%c0_32, %c0_33] : memref<194x192xf32, #tpu.memory_space<vmem>>, vector<32x192xf32>
    %cst_34 = arith.constant dense<0.000000e+00> : vector<2x192xf32>
    %91 = tpu.matmul %37, %90, %cst_34 {dimension_numbers = #tpu.dot_dimension_numbers<[1], [0], [0], [1], [0, 0, 1, 1], [], []>} : vector<2x32xf32>, vector<32x192xf32>, vector<2x192xf32> -> vector<2x192xf32>
    %c32_35 = arith.constant 32 : index
    %c0_36 = arith.constant 0 : index
    %92 = vector.load %arg5[%c32_35, %c0_36] : memref<194x192xf32, #tpu.memory_space<vmem>>, vector<32x192xf32>
    %cst_37 = arith.constant dense<0.000000e+00> : vector<2x192xf32>
    %93 = tpu.matmul %62, %92, %cst_37 {dimension_numbers = #tpu.dot_dimension_numbers<[1], [0], [0], [1], [0, 0, 1, 1], [], []>} : vector<2x32xf32>, vector<32x192xf32>, vector<2x192xf32> -> vector<2x192xf32>
    %94 = arith.addf %91, %93 : vector<2x192xf32>
    %c64_38 = arith.constant 64 : index
    %c0_39 = arith.constant 0 : index
    %95 = vector.load %arg5[%c64_38, %c0_39] : memref<194x192xf32, #tpu.memory_space<vmem>>, vector<32x192xf32>
    %cst_40 = arith.constant dense<0.000000e+00> : vector<2x192xf32>
    %96 = tpu.matmul %87, %95, %cst_40 {dimension_numbers = #tpu.dot_dimension_numbers<[1], [0], [0], [1], [0, 0, 1, 1], [], []>} : vector<2x32xf32>, vector<32x192xf32>, vector<2x192xf32> -> vector<2x192xf32>
    %97 = arith.addf %94, %96 : vector<2x192xf32>
    %c96_41 = arith.constant 96 : index
    %c0_42 = arith.constant 0 : index
    %98 = vector.load %arg5[%c96_41, %c0_42] : memref<194x192xf32, #tpu.memory_space<vmem>>, vector<32x192xf32>
    %cst_43 = arith.constant dense<0.000000e+00> : vector<2x192xf32>
    %99 = tpu.matmul %1, %98, %cst_43 {dimension_numbers = #tpu.dot_dimension_numbers<[1], [0], [0], [1], [0, 0, 1, 1], [], []>} : vector<2x32xf32>, vector<32x192xf32>, vector<2x192xf32> -> vector<2x192xf32>
    %100 = arith.addf %97, %99 : vector<2x192xf32>
    %101 = vector.broadcast %88 : vector<1x192xf32> to vector<2x192xf32>
    %102 = arith.addf %100, %101 : vector<2x192xf32>
    %c128 = arith.constant 128 : index
    %c0_44 = arith.constant 0 : index
    %103 = vector.load %arg5[%c128, %c0_44] : memref<194x192xf32, #tpu.memory_space<vmem>>, vector<64x192xf32>
    %cst_45 = arith.constant dense<0.000000e+00> : vector<2x192xf32>
    %104 = tpu.matmul %2, %103, %cst_45 {dimension_numbers = #tpu.dot_dimension_numbers<[1], [0], [0], [1], [0, 0, 1, 1], [], []>} : vector<2x64xf32>, vector<64x192xf32>, vector<2x192xf32> -> vector<2x192xf32>
    %105 = vector.broadcast %89 : vector<1x192xf32> to vector<2x192xf32>
    %106 = arith.addf %104, %105 : vector<2x192xf32>
    %107 = vector.extract_strided_slice %102 {offsets = [0, 0], sizes = [2, 128], strides = [1, 1]} : vector<2x192xf32> to vector<2x128xf32>
    %108 = vector.extract_strided_slice %106 {offsets = [0, 0], sizes = [2, 128], strides = [1, 1]} : vector<2x192xf32> to vector<2x128xf32>
    %109 = arith.addf %107, %108 : vector<2x128xf32>
    %110 = arith.negf %109 : vector<2x128xf32>
    %111 = math.exp %110 : vector<2x128xf32>
    %cst_46 = arith.constant 1.000000e+00 : f32
    %112 = vector.broadcast %cst_46 : f32 to vector<2x128xf32>
    %113 = arith.addf %112, %111 : vector<2x128xf32>
    %114 = arith.divf %112, %113 : vector<2x128xf32>
    %115 = vector.extract_strided_slice %114 {offsets = [0, 0], sizes = [2, 64], strides = [1, 1]} : vector<2x128xf32> to vector<2x64xf32>
    %116 = vector.extract_strided_slice %114 {offsets = [0, 64], sizes = [2, 64], strides = [1, 1]} : vector<2x128xf32> to vector<2x64xf32>
    %117 = vector.extract_strided_slice %102 {offsets = [0, 128], sizes = [2, 64], strides = [1, 1]} : vector<2x192xf32> to vector<2x64xf32>
    %118 = vector.extract_strided_slice %106 {offsets = [0, 128], sizes = [2, 64], strides = [1, 1]} : vector<2x192xf32> to vector<2x64xf32>
    %119 = arith.mulf %115, %118 : vector<2x64xf32>
    %120 = arith.addf %117, %119 : vector<2x64xf32>
    %121 = math.tanh %120 : vector<2x64xf32>
    %cst_47 = arith.constant 1.000000e+00 : f32
    %122 = vector.broadcast %cst_47 : f32 to vector<2x64xf32>
    %123 = arith.subf %122, %116 : vector<2x64xf32>
    %124 = arith.mulf %123, %121 : vector<2x64xf32>
    %125 = arith.mulf %116, %2 : vector<2x64xf32>
    %126 = arith.addf %124, %125 : vector<2x64xf32>
    %c192_48 = arith.constant 192 : index
    %c0_49 = arith.constant 0 : index
    %127 = vector.load %arg6[%c192_48, %c0_49] : memref<193x64xf32, #tpu.memory_space<vmem>>, vector<1x64xf32>
    %c0_50 = arith.constant 0 : index
    %c0_51 = arith.constant 0 : index
    %128 = vector.load %arg6[%c0_50, %c0_51] : memref<193x64xf32, #tpu.memory_space<vmem>>, vector<64x64xf32>
    %cst_52 = arith.constant dense<0.000000e+00> : vector<2x64xf32>
    %129 = tpu.matmul %126, %128, %cst_52 {dimension_numbers = #tpu.dot_dimension_numbers<[1], [0], [0], [1], [0, 0, 1, 1], [], []>} : vector<2x64xf32>, vector<64x64xf32>, vector<2x64xf32> -> vector<2x64xf32>
    %c64_53 = arith.constant 64 : index
    %c0_54 = arith.constant 0 : index
    %130 = vector.load %arg6[%c64_53, %c0_54] : memref<193x64xf32, #tpu.memory_space<vmem>>, vector<32x64xf32>
    %cst_55 = arith.constant dense<0.000000e+00> : vector<2x64xf32>
    %131 = tpu.matmul %37, %130, %cst_55 {dimension_numbers = #tpu.dot_dimension_numbers<[1], [0], [0], [1], [0, 0, 1, 1], [], []>} : vector<2x32xf32>, vector<32x64xf32>, vector<2x64xf32> -> vector<2x64xf32>
    %132 = arith.addf %129, %131 : vector<2x64xf32>
    %c96_56 = arith.constant 96 : index
    %c0_57 = arith.constant 0 : index
    %133 = vector.load %arg6[%c96_56, %c0_57] : memref<193x64xf32, #tpu.memory_space<vmem>>, vector<32x64xf32>
    %cst_58 = arith.constant dense<0.000000e+00> : vector<2x64xf32>
    %134 = tpu.matmul %62, %133, %cst_58 {dimension_numbers = #tpu.dot_dimension_numbers<[1], [0], [0], [1], [0, 0, 1, 1], [], []>} : vector<2x32xf32>, vector<32x64xf32>, vector<2x64xf32> -> vector<2x64xf32>
    %135 = arith.addf %132, %134 : vector<2x64xf32>
    %c128_59 = arith.constant 128 : index
    %c0_60 = arith.constant 0 : index
    %136 = vector.load %arg6[%c128_59, %c0_60] : memref<193x64xf32, #tpu.memory_space<vmem>>, vector<32x64xf32>
    %cst_61 = arith.constant dense<0.000000e+00> : vector<2x64xf32>
    %137 = tpu.matmul %87, %136, %cst_61 {dimension_numbers = #tpu.dot_dimension_numbers<[1], [0], [0], [1], [0, 0, 1, 1], [], []>} : vector<2x32xf32>, vector<32x64xf32>, vector<2x64xf32> -> vector<2x64xf32>
    %138 = arith.addf %135, %137 : vector<2x64xf32>
    %c160 = arith.constant 160 : index
    %c0_62 = arith.constant 0 : index
    %139 = vector.load %arg6[%c160, %c0_62] : memref<193x64xf32, #tpu.memory_space<vmem>>, vector<32x64xf32>
    %cst_63 = arith.constant dense<0.000000e+00> : vector<2x64xf32>
    %140 = tpu.matmul %1, %139, %cst_63 {dimension_numbers = #tpu.dot_dimension_numbers<[1], [0], [0], [1], [0, 0, 1, 1], [], []>} : vector<2x32xf32>, vector<32x64xf32>, vector<2x64xf32> -> vector<2x64xf32>
    %141 = arith.addf %138, %140 : vector<2x64xf32>
    %142 = vector.broadcast %127 : vector<1x64xf32> to vector<2x64xf32>
    %143 = arith.addf %141, %142 : vector<2x64xf32>
    %144 = tpu.concatenate %143, %126 in 1 : vector<2x64xf32>, vector<2x64xf32> -> vector<2x128xf32>
    %c0_64 = arith.constant 0 : index
    %c0_65 = arith.constant 0 : index
    %145 = vector.load %arg7[%c0_64, %c0_65] : memref<2x128xf32, #tpu.memory_space<vmem>>, vector<2x128xf32>
    tpu.vector_store %arg7[%c0_64, %c0_65], %144 {strides = array<i32>} : memref<2x128xf32, #tpu.memory_space<vmem>>, vector<2x128xf32>,
    return
  }
  func.func @transform_0(%arg0: i32) -> (i32, i32) {
    %c0_i32 = arith.constant 0 : i32
    %c0_i32_0 = arith.constant 0 : i32
    return %arg0, %c0_i32 : i32, i32
  }
  func.func @transform_1(%arg0: i32) -> (i32, i32, i32) {
    %c0_i32 = arith.constant 0 : i32
    %c0_i32_0 = arith.constant 0 : i32
    %c0_i32_1 = arith.constant 0 : i32
    return %arg0, %c0_i32, %c0_i32_0 : i32, i32, i32
  }
  func.func @transform_2(%arg0: i32) -> (i32, i32, i32) {
    %c0_i32 = arith.constant 0 : i32
    %c0_i32_0 = arith.constant 0 : i32
    %c0_i32_1 = arith.constant 0 : i32
    return %arg0, %c0_i32, %c0_i32_0 : i32, i32, i32
  }
  func.func @transform_3(%arg0: i32) -> (i32, i32) {
    %c0_i32 = arith.constant 0 : i32
    %c0_i32_0 = arith.constant 0 : i32
    %c0_i32_1 = arith.constant 0 : i32
    return %c0_i32, %c0_i32_0 : i32, i32
  }
  func.func @transform_4(%arg0: i32) -> (i32, i32) {
    %c0_i32 = arith.constant 0 : i32
    %c0_i32_0 = arith.constant 0 : i32
    %c0_i32_1 = arith.constant 0 : i32
    return %c0_i32, %c0_i32_0 : i32, i32
  }
  func.func @transform_5(%arg0: i32) -> (i32, i32) {
    %c0_i32 = arith.constant 0 : i32
    %c0_i32_0 = arith.constant 0 : i32
    %c0_i32_1 = arith.constant 0 : i32
    return %c0_i32, %c0_i32_0 : i32, i32
  }
  func.func @transform_6(%arg0: i32) -> (i32, i32) {
    %c0_i32 = arith.constant 0 : i32
    %c0_i32_0 = arith.constant 0 : i32
    return %arg0, %c0_i32 : i32, i32
  }
}

</mosaic_0001>

<bundles_post_ra>
// kernel: tpu_custom_call.1
= control target key start
LH: loop header
LB: loop body
LE: loop exit
PB: predicated region body
PF: predicated region fallthrough
CT: control target
= control target key end

     0   :  { %s1899_s25 = smov 64   ;;  %s2412_s0 = inlined_call_operand.vmem [shape: f32[2,96], index: 0, kind: input, shape index: {}]   ;;  %s2413_s1 = inlined_call_operand.vmem [shape: f32[2,16,32], index: 1, kind: input, shape index: {}]   ;;  %s2414_s2 = inlined_call_operand.vmem [shape: f32[2,16,32], index: 2, kind: input, shape index: {}]   ;;  %s2415_s3 = inlined_call_operand.vmem [shape: f32[99,32], index: 3, kind: input, shape index: {}]   ;;  %s2416_s4 = inlined_call_operand.vmem [shape: f32[194,192], index: 4, kind: input, shape index: {}]   ;;  %s2417_s5 = inlined_call_operand.vmem [shape: f32[193,64], index: 5, kind: input, shape index: {}]   ;;  %s2418_s6 = inlined_call_operand.hbm [shape: f32[2,128], index: 6, kind: output, shape index: {}]  }
   0x1   :  { %v1945_v0 = vld [vmem:[%s2412_s0] sm:$0x3]  ;;  %v34_v2 = vld [vmem:[%s2415_s3 + $0x8] sm:$0xff]  ;;  %v35_v3 = vld [vmem:[%s2415_s3 + $0x10] sm:$0xff] }
   0x2   :  { %v33_v1 = vld [vmem:[%s2415_s3] sm:$0xff]  ;;  %49 = vrot.lane.b32.xlu0 %v1945_v0, %s1899_s25  ;;  %v36_v4 = vld [vmem:[%s2415_s3 + $0x18] sm:$0xff] }
   0x3   :  { %v1702_v5 = vpack.c.bf16 %v34_v2, %v33_v1  ;;  %v1706_v6 = vpack.c.bf16 %v36_v4, %v35_v3 }
   0x4   :  { %11 = vsyncpa [#allocation3], 0  ;;  %v1900_v7 = vmov 1966171168   ;;  %v57_v9 = vlaneseq  ;;  %v1980_v22 = vld [vmem:[%s2413_s1 + $0x8] sm:$0xff]  ;;  %v1985_v23 = vld [vmem:[%s2413_s1] sm:$0xff] }
   0x5   :  { %1703 = vmatprep.subr.bf16.mxu0 %v1702_v5  ;;  %v55_v8 = vunpack.c.l.s4 %v1900_v7  ;;  %v1990_v25 = vld [vmem:[%s2413_s1 + $0x10] sm:$0xff]  ;;  %vm94_vm0 = vcmask 261120   ;;  %v1997_v29 = vld [vmem:[%s2413_s1 + $0x18] sm:$0xff]  ;;  %v1533_v36 = vld [vmem:[%s2415_s3 + $0x60] ss:$0 sm:$0xff]  ;;  %vm284_vm1 = vcmask 1041409  }
   0x6   :  { %1705 = vmatpush3.bf16.msra.mxu0 %v1702_v5  ;;  %v1961_v11 = vshrl.u32 %v57_v9, 7  ;;  %v37_v49 = vld [vmem:[%s2415_s3 + $0x20] sm:$0xff]  ;;  %v38_v50 = vld [vmem:[%s2415_s3 + $0x28] sm:$0xff]  ;;  %v39_v51 = vld [vmem:[%s2415_s3 + $0x30] sm:$0xff]  ;;  %s1903_s11 = smov 96   ;;  %vm1030_vm2 = vcmask 523264  }
   0x7   :  { %1707 = vmatprep.subr.bf16.mxu0 %v1706_v6  ;;  %v56_v10 = vunpack.c.0.s8 %v55_v8  ;;  %v1710_v52 = vpack.c.bf16 %v38_v50, %v37_v49  ;;  %v40_v53 = vld [vmem:[%s2415_s3 + $0x38] sm:$0xff]  ;;  %vm1904_vm3 = vmmov 0  }
   0x8   :  { %v1969_v16 = vsub.s32 0, %v1961_v11  ;;  %v1714_v54 = vpack.c.bf16 %v40_v53, %v39_v51 }
   0x9   :  { %v1964_v12 = vsub.s32 %v56_v10, %v1961_v11  ;;  %1711 = vmatprep.subr.bf16.mxu1 %v1710_v52 }
   0xa   :  { %1709 = vmatpush3.bf16.msra.mxu0 %v1706_v6  ;;  %1713 = vmatpush3.bf16.msra.mxu1 %v1710_v52 }
   0xb   :  { %1715 = vmatprep.subr.bf16.mxu1 %v1714_v54 }
   0xe   :  { %1717 = vmatpush3.bf16.msra.mxu1 %v1714_v54 }
  0x74   :  { %v50_v13 = vpop.permute.xlu0 %49 }
  0x75   :  { %v52_v14 = vadd.f32 %v50_v13, %v1945_v0 }
  0x77   :  { %v60_v15 = vrot.slane %v52_v14, %v1964_v12 }
  0x79   :  { %v61_v17 = vcombine.high %v60_v15, %v60_v15  ;;  %v68_v18 = vrot.slane %v60_v15, %v1964_v12 }
  0x7b   :  { %v79_v19 = vrot.slane %v68_v18, %v1969_v16  ;;  %v75_v20 = vrot.slane %v61_v17, %v1964_v12 }
  0x7d   :  { %84 = vrot.lane.b32.xlu0 %v79_v19, %s1899_s25  ;;  %v83_v21 = vrot.slane %v75_v20, %v1969_v16 }
  0x7f   :  { %86 = vrot.lane.b32.xlu1 %v83_v21, %s1899_s25 }
  0xef   :  { %v85_v24 = vpop.permute.xlu0 %84 }
  0xf0   :  { %v91_v26 = vadd.f32 %v85_v24, %v1980_v22  ;;  %v90_v27 = vadd.f32 %v85_v24, %v1985_v23 }
  0xf1   :  { %v87_v28 = vpop.permute.xlu1 %86 }
  0xf2   :  { %v92_v30 = vadd.f32 %v87_v28, %v1990_v25  ;;  %1611 = vmatprep.mubr.msk.f32.mxu0 %vm94_vm0, %v90_v27  ;;  %v93_v31 = vadd.f32 %v87_v28, %v1997_v29 }
  0xf3   :  { %1612 = vmatmul.mubr.msk.f32.vlgmr.msra.gmra.mrb[0].mxu0 %vm94_vm0, %v91_v26 }
  0xf4   :  { %1614 = vmatprep.mubr.msk.f32.mxu0 %vm94_vm0, %v92_v30 }
  0xf7   :  { %1615 = vmatmul.mubr.msk.f32.gmra.mrb[2].mxu0 %vm94_vm0, %v93_v31 }
 0x1c6   :  { %v1613_v32 = vpop.f32.mrb[0].mxu0 }
 0x1c7   :  { %1824 = vtanh.f32 %v1613_v32  ;;  %v173_v33 = vpop.f32.mrb[1].mxu0 }
 0x1c8   :  { %1826 = vtanh.f32 %v173_v33 }
 0x1ca   :  { %v1616_v34 = vpop.f32.mrb[2].mxu0 }
 0x1cb   :  { %1828 = vtanh.f32 %v1616_v34  ;;  %v183_v35 = vpop.f32.mrb[3].mxu0 }
 0x1cc   :  { %1830 = vtanh.f32 %v183_v35 }
 0x1d1   :  { %v1825_v37 = vpop.eup %1824 }
 0x1d2   :  { %v1827_v38 = vpop.eup %1826  ;;  %v201_v39 = vmul.f32 %v1825_v37, %v1533_v36 }
 0x1d3   :  { %v200_v40 = vmul.f32 %v1827_v38, %v1533_v36 }
 0x1d4   :  { %v207_v41 = vsel %vm94_vm0, %v201_v39, 0.0 }
 0x1d5   :  { %v1829_v42 = vpop.eup %1828  ;;  %208 = vadd.xlane.f32.xlu0 %v207_v41  ;;  %v204_v43 = vsel %vm94_vm0, %v200_v40, 0.0 }
 0x1d6   :  { %v1831_v44 = vpop.eup %1830  ;;  %205 = vadd.xlane.f32.xlu1 %v204_v43  ;;  %v203_v45 = vmul.f32 %v1829_v42, %v1533_v36 }
 0x1d7   :  { %v202_v46 = vmul.f32 %v1831_v44, %v1533_v36 }
 0x1d8   :  { %v213_v47 = vsel %vm94_vm0, %v203_v45, 0.0 }
 0x1d9   :  { %v210_v48 = vsel %vm94_vm0, %v202_v46, 0.0 }
 0x1da   :  { %214 = vadd.xlane.f32.xlu1 %v213_v47  ;;  %211 = vadd.xlane.f32.xlu0 %v210_v48 }
 0x262   :  { %v209_v55 = vpop.xlane.xlu0 %208 }
 0x263   :  { %v206_v56 = vpop.xlane.xlu1 %205 }
 0x264   :  { %v216_v57 = vmax.f32 %v206_v56, %v209_v55 }
 0x266   :  { %v217_v58 = vrot.slane %v216_v57, 4 }
 0x267   :  { %v212_v59 = vpop.xlane.xlu0 %211  ;;  %v215_v60 = vpop.xlane.xlu1 %214 }
 0x268   :  { %v218_v61 = vmax.f32 %v216_v57, %v217_v58  ;;  %v223_v62 = vmax.f32 %v212_v59, %v215_v60 }
 0x26a   :  { %v219_v63 = vrot.slane %v218_v61, 2  ;;  %v224_v1 = vrot.slane %v223_v62, 4 }
 0x26c   :  { %v220_v2 = vmax.f32 %v218_v61, %v219_v63  ;;  %v225_v3 = vmax.f32 %v223_v62, %v224_v1 }
 0x26e   :  { %v221_v4 = vrot.slane %v220_v2, 1  ;;  %v226_v5 = vrot.slane %v225_v3, 2 }
 0x270   :  { %v222_v6 = vmax.f32 %v220_v2, %v221_v4  ;;  %v227_v7 = vmax.f32 %v225_v3, %v226_v5 }
 0x272   :  { %v230_v8 = vsub.f32 %v206_v56, %v222_v6  ;;  %v231_v9 = vsub.f32 %v209_v55, %v222_v6  ;;  %v228_v10 = vrot.slane %v227_v7, 1 }
 0x274   :  { %v234_v13 = vmul.f32 1.442695, %v230_v8  ;;  %v236_v14 = vmul.f32 1.442695, %v231_v9  ;;  %v229_v15 = vmax.f32 %v227_v7, %v228_v10  ;;  %v2045_v7 = vld [vmem:[%s2414_s2] sm:$0xff]  ;;  %v2052_v10 = vld [vmem:[%s2414_s2 + $0x10] sm:$0xff] }
 0x276   :  { %1832 = vpow2.f32 %v234_v13  ;;  %v232_v17 = vsub.f32 %v212_v59, %v229_v15  ;;  %v233_v18 = vsub.f32 %v215_v60, %v229_v15 }
 0x277   :  { %1834 = vpow2.f32 %v236_v14 }
 0x278   :  { %v238_v19 = vmul.f32 1.442695, %v232_v17  ;;  %v240_v20 = vmul.f32 1.442695, %v233_v18 }
 0x27a   :  { %1836 = vpow2.f32 %v238_v19  ;;  %v1536_v19 = vld [vmem:[%s2415_s3 + $0x61] ss:$0 sm:$0xff] }
 0x27b   :  { %1838 = vpow2.f32 %v240_v20 }
 0x280   :  { %v1833_v21 = vpop.eup %1832 }
 0x281   :  { %v1835_v24 = vpop.eup %1834  ;;  %v242_v26 = vmul.f32 %v1833_v21, %v1985_v23 }
 0x282   :  { %v243_v27 = vmul.f32 %v1835_v24, %v1980_v22  ;;  %v264_v28 = vadd.f32 %v1835_v24, %v1833_v21 }
 0x283   :  { %v246_v30 = vsel %vm94_vm0, %v242_v26, 0.0 }
 0x284   :  { %v1837_v31 = vpop.eup %1836  ;;  %v247_v32 = vsel %vm94_vm0, %v243_v27, 0.0  ;;  %v265_v33 = vrot.slane %v264_v28, 4 }
 0x285   :  { %v1839_v34 = vpop.eup %1838  ;;  %v248_v35 = vadd.f32 %v247_v32, %v246_v30  ;;  %v244_v36 = vmul.f32 %v1837_v31, %v1990_v25  ;;  %v666_v30 = vld [vmem:[%s2416_s4 + $0x48] sm:$0xff]  ;;  %v665_v32 = vld [vmem:[%s2416_s4 + $0x40] sm:$0xff] }
 0x286   :  { %v266_v37 = vadd.f32 %v265_v33, %v264_v28  ;;  %v245_v38 = vmul.f32 %v1839_v34, %v1997_v29  ;;  %v271_v39 = vadd.f32 %v1839_v34, %v1837_v31  ;;  %v668_v31 = vld [vmem:[%s2416_s4 + $0x58] sm:$0xff]  ;;  %v667_v34 = vld [vmem:[%s2416_s4 + $0x50] sm:$0xff] }
 0x287   :  { %v255_v40 = vsel %vm94_vm0, %v244_v36, 0.0  ;;  %v249_v42 = vrot.slane %v248_v35, 4  ;;  %v1726_v33 = vpack.c.bf16 %v668_v31, %v666_v30  ;;  %v672_v36 = vld [vmem:[%s2416_s4 + $0x78] sm:$0xff] }
 0x288   :  { %v267_v23 = vrot.slane %v266_v37, 2  ;;  %v256_v22 = vsel %vm94_vm0, %v245_v38, 0.0  ;;  %v272_v41 = vrot.slane %v271_v39, 4  ;;  %v1728_v38 = vpack.c.bf16 %v667_v34, %v665_v32 }
 0x289   :  { %v257_v43 = vadd.f32 %v256_v22, %v255_v40  ;;  %v250_v49 = vadd.f32 %v249_v42, %v248_v35  ;;  %v670_v35 = vld [vmem:[%s2416_s4 + $0x68] sm:$0xff]  ;;  %v669_v40 = vld [vmem:[%s2416_s4 + $0x60] sm:$0xff]  ;;  %1727 = vmatprep.subr.bf16.mxu1 %v1726_v33  ;;  %v660_v42 = vld [vmem:[%s2416_s4 + $0x18] sm:$0xff] }
 0x28a   :  { %v268_v44 = vadd.f32 %v267_v23, %v266_v37  ;;  %v273_v45 = vadd.f32 %v272_v41, %v271_v39  ;;  %v1901_v37 = vmov 0.0   ;;  %v1730_v39 = vpack.c.bf16 %v672_v36, %v670_v35  ;;  %v671_v23 = vld [vmem:[%s2416_s4 + $0x70] sm:$0xff]  ;;  %v658_v41 = vld [vmem:[%s2416_s4 + $0x8] sm:$0xff] }
 0x28b   :  { %v258_v46 = vrot.slane %v257_v43, 4  ;;  %v251_v29 = vrot.slane %v250_v49, 2  ;;  %v1732_v22 = vpack.c.bf16 %v671_v23, %v669_v40 }
 0x28c   :  { %v269_v47 = vrot.slane %v268_v44, 1  ;;  %v274_v48 = vrot.slane %v273_v45, 2 }
 0x28d   :  { %v259_v50 = vadd.f32 %v258_v46, %v257_v43  ;;  %v252_v55 = vadd.f32 %v251_v29, %v250_v49  ;;  %v1734_v43 = vpack.c.bf16 %v660_v42, %v658_v41  ;;  %v659_v41 = vld [vmem:[%s2416_s4 + $0x10] sm:$0xff] }
 0x28e   :  { %v270_v25 = vadd.f32 %v269_v47, %v268_v44  ;;  %v275_v51 = vadd.f32 %v274_v48, %v273_v45  ;;  %v41_v44 = vld [vmem:[%s2415_s3 + $0x40] sm:$0xff]  ;;  %v42_v45 = vld [vmem:[%s2415_s3 + $0x48] sm:$0xff]  ;;  %v43_v47 = vld [vmem:[%s2415_s3 + $0x50] sm:$0xff] }
 0x28f   :  { %v260_v53 = vrot.slane %v259_v50, 2  ;;  %v253_v57 = vrot.slane %v252_v55, 1  ;;  %v1718_v46 = vpack.c.bf16 %v42_v45, %v41_v44  ;;  %v44_v48 = vld [vmem:[%s2415_s3 + $0x58] sm:$0xff]  ;;  %v662_v44 = vld [vmem:[%s2416_s4 + $0x28] sm:$0xff] }
 0x290   :  { %v276_v52 = vrot.slane %v275_v51, 1  ;;  %1840 = vrcp.f32 %v270_v25  ;;  %v1722_v49 = vpack.c.bf16 %v44_v48, %v43_v47  ;;  %v664_v45 = vld [vmem:[%s2416_s4 + $0x38] sm:$0xff] }
 0x291   :  { %v261_v56 = vadd.f32 %v260_v53, %v259_v50  ;;  %v254_v60 = vadd.f32 %v253_v57, %v252_v55  ;;  %1719 = vmatprep.subr.bf16.mxu0 %v1718_v46 }
 0x292   :  { %v277_v54 = vadd.f32 %v276_v52, %v275_v51  ;;  %1721 = vmatpush3.bf16.msra.mxu0 %v1718_v46 }
 0x293   :  { %v262_v58 = vrot.slane %v261_v56, 1  ;;  %1723 = vmatprep.subr.bf16.mxu0 %v1722_v49 }
 0x294   :  { %1842 = vrcp.f32 %v277_v54 }
 0x295   :  { %v263_v61 = vadd.f32 %v262_v58, %v261_v56 }
 0x296   :  { %1725 = vmatpush3.bf16.msra.mxu0 %v1722_v49 }
 0x29a   :  { %v1841_v59 = vpop.eup %1840 }
 0x29b   :  { %v280_v63 = vmul.f32 %v1841_v59, %v254_v60 }
 0x29e   :  { %v1843_v62 = vpop.eup %1842 }
 0x29f   :  { %v281_v1 = vmul.f32 %v1843_v62, %v263_v61 }
 0x2a1   :  { %v2033_v2 = vsel %vm284_vm1, %v281_v1, %v280_v63 }
 0x2a2   :  { %v2037_v3 = vadd.f32 %v2033_v2, %v1945_v0 }
 0x2a4   :  { %v295_v4 = vrot.slane %v2037_v3, %v1964_v12 }
 0x2a6   :  { %v296_v5 = vcombine.high %v295_v4, %v295_v4  ;;  %v303_v6 = vrot.slane %v295_v4, %v1964_v12 }
 0x2a8   :  { %v314_v8 = vrot.slane %v303_v6, %v1969_v16  ;;  %v310_v9 = vrot.slane %v296_v5, %v1964_v12 }
 0x2aa   :  { %v321_v13 = vadd.f32 %v314_v8, %v2045_v7  ;;  %v318_v14 = vrot.slane %v310_v9, %v1969_v16 }
 0x2ac   :  { %1625 = vmatprep.mubr.msk.f32.mxu1 %vm94_vm0, %v321_v13  ;;  %v322_v15 = vadd.f32 %v318_v14, %v2052_v10 }
 0x2ae   :  { %1626 = vmatmul.mubr.msk.f32.vlgmr.msra.gmra.mrb[0].mxu1 %vm94_vm0, %v322_v15 }
 0x2af   :  { %739 = vmatprep.mubr.f32.mxu1 %v1901_v37  ;;  %1729 = vmatpush1.bf16.msra.mxu1 %v1728_v38 }
 0x2b0   :  { %1731 = vmatprep.subr.bf16.mxu1 %v1730_v39 }
 0x2b3   :  { %1733 = vmatpush1.bf16.msra.mxu1 %v1732_v22  ;;  %v657_v22 = vld [vmem:[%s2416_s4] sm:$0xff] }
 0x2b4   :  { %1735 = vmatprep.subr.bf16.mxu1 %v1734_v43  ;;  %v1736_v49 = vpack.c.bf16 %v659_v41, %v657_v22  ;;  %v1902_v22 = vmov 0.0|0.0   ;;  %v820_v41 = vld [vmem:[%s2416_s4 + $0x88] sm:$0xff] }
 0x381   :  { %v1627_v17 = vpop.f32.mrb[0].mxu1 }
 0x382   :  { %1844 = vtanh.f32 %v1627_v17  ;;  %v395_v18 = vpop.f32.mrb[1].mxu1 }
 0x383   :  { %1846 = vtanh.f32 %v395_v18 }
 0x38c   :  { %v1845_v20 = vpop.eup %1844 }
 0x38d   :  { %v1847_v21 = vpop.eup %1846  ;;  %v411_v24 = vmul.f32 %v1845_v20, %v1536_v19 }
 0x38e   :  { %v410_v26 = vmul.f32 %v1847_v21, %v1536_v19 }
 0x38f   :  { %v415_v27 = vsel %vm94_vm0, %v411_v24, 0.0 }
 0x390   :  { %416 = vadd.xlane.f32.xlu1 %v415_v27  ;;  %v412_v28 = vsel %vm94_vm0, %v410_v26, 0.0 }
 0x391   :  { %413 = vadd.xlane.f32.xlu0 %v412_v28 }
 0x41d   :  { %v417_v50 = vpop.xlane.xlu1 %416 }
 0x41e   :  { %v424_v25 = vrot.slane %v417_v50, 4  ;;  %v414_v51 = vpop.xlane.xlu0 %413 }
 0x41f   :  { %v418_v52 = vrot.slane %v414_v51, 4 }
 0x420   :  { %v425_v29 = vmax.f32 %v417_v50, %v424_v25  ;;  %v661_v25 = vld [vmem:[%s2416_s4 + $0x20] sm:$0xff] }
 0x421   :  { %v419_v53 = vmax.f32 %v414_v51, %v418_v52 }
 0x422   :  { %v426_v54 = vrot.slane %v425_v29, 2 }
 0x423   :  { %v420_v55 = vrot.slane %v419_v53, 2 }
 0x424   :  { %v427_v56 = vmax.f32 %v425_v29, %v426_v54 }
 0x425   :  { %v421_v57 = vmax.f32 %v419_v53, %v420_v55 }
 0x426   :  { %v428_v58 = vrot.slane %v427_v56, 1 }
 0x427   :  { %v422_v59 = vrot.slane %v421_v57, 1 }
 0x428   :  { %v429_v60 = vmax.f32 %v427_v56, %v428_v58 }
 0x429   :  { %v423_v61 = vmax.f32 %v421_v57, %v422_v59  ;;  %v2142_v57 = vld [vmem:[%s2414_s2 + $0x8] sm:$0xff]  ;;  %v2149_v59 = vld [vmem:[%s2414_s2 + $0x18] sm:$0xff] }
 0x42a   :  { %v431_v62 = vsub.f32 %v417_v50, %v429_v60  ;;  %v1738_v50 = vpack.c.bf16 %v664_v45, %v662_v44  ;;  %v821_v45 = vld [vmem:[%s2416_s4 + $0x90] sm:$0xff] }
 0x42b   :  { %v430_v63 = vsub.f32 %v414_v51, %v423_v61  ;;  %v663_v51 = vld [vmem:[%s2416_s4 + $0x30] sm:$0xff] }
 0x42c   :  { %v434_v1 = vmul.f32 1.442695, %v431_v62  ;;  %v1740_v53 = vpack.c.bf16 %v663_v51, %v661_v25  ;;  %v1002_v62 = vld [vmem:[%s2416_s4 + $0x108] sm:$0xff]  ;;  %v825_v25 = vld [vmem:[%s2416_s4 + $0xb0] sm:$0xff] }
 0x42d   :  { %v432_v4 = vmul.f32 1.442695, %v430_v63  ;;  %v1004_v63 = vld [vmem:[%s2416_s4 + $0x118] sm:$0xff]  ;;  %v906_v51 = vld [vmem:[%s2416_s4 + $0xc8] sm:$0xff] }
 0x42e   :  { %1848 = vpow2.f32 %v434_v1  ;;  %v1001_v1 = vld [vmem:[%s2416_s4 + $0x100] sm:$0xff] }
 0x42f   :  { %1850 = vpow2.f32 %v432_v4  ;;  %v1758_v4 = vpack.c.bf16 %v1004_v63, %v1002_v62 }
 0x431   :  { %1759 = vmatprep.subr.bf16.mxu0 %v1758_v4  ;;  %v1137_v4 = vld [vmem:[%s2417_s5 + $0x58] sm:$0xff] }
 0x438   :  { %v1849_v5 = vpop.eup %1848 }
 0x439   :  { %v1851_v6 = vpop.eup %1850  ;;  %v437_v8 = vmul.f32 %v1849_v5, %v2052_v10  ;;  %v458_v9 = vrot.slane %v1849_v5, 4 }
 0x43a   :  { %v436_v13 = vmul.f32 %v1851_v6, %v2045_v7  ;;  %v452_v14 = vrot.slane %v1851_v6, 4 }
 0x43b   :  { %v445_v15 = vsel %vm94_vm0, %v437_v8, 0.0  ;;  %v459_v17 = vadd.f32 %v1849_v5, %v458_v9  ;;  %v1003_v5 = vld [vmem:[%s2416_s4 + $0x110] sm:$0xff]  ;;  %v1008_v8 = vld [vmem:[%s2416_s4 + $0x138] sm:$0xff] }
 0x43c   :  { %v438_v18 = vsel %vm94_vm0, %v436_v13, 0.0  ;;  %v446_v19 = vrot.slane %v445_v15, 4  ;;  %v453_v20 = vadd.f32 %v1851_v6, %v452_v14  ;;  %v1006_v6 = vld [vmem:[%s2416_s4 + $0x128] sm:$0xff]  ;;  %v1760_v9 = vpack.c.bf16 %v1003_v5, %v1001_v1  ;;  %v1005_v14 = vld [vmem:[%s2416_s4 + $0x120] sm:$0xff]  ;;  %v1136_v1 = vld [vmem:[%s2417_s5 + $0x50] sm:$0xff] }
 0x43d   :  { %v439_v21 = vrot.slane %v438_v18, 4  ;;  %v460_v24 = vrot.slane %v459_v17, 2  ;;  %v1762_v13 = vpack.c.bf16 %v1008_v8, %v1006_v6 }
 0x43e   :  { %v447_v26 = vadd.f32 %v446_v19, %v445_v15  ;;  %v454_v27 = vrot.slane %v453_v20, 2  ;;  %v1007_v15 = vld [vmem:[%s2416_s4 + $0x130] sm:$0xff] }
 0x43f   :  { %v440_v28 = vadd.f32 %v439_v21, %v438_v18  ;;  %v461_v30 = vadd.f32 %v460_v24, %v459_v17  ;;  %v1010_v17 = vld [vmem:[%s2416_s4 + $0x148] sm:$0xff]  ;;  %v1012_v18 = vld [vmem:[%s2416_s4 + $0x158] sm:$0xff]  ;;  %v1764_v19 = vpack.c.bf16 %v1007_v15, %v1005_v14  ;;  %v1009_v21 = vld [vmem:[%s2416_s4 + $0x140] sm:$0xff] }
 0x440   :  { %v455_v31 = vadd.f32 %v454_v27, %v453_v20  ;;  %v448_v10 = vrot.slane %v447_v26, 2  ;;  %v1766_v20 = vpack.c.bf16 %v1012_v18, %v1010_v17  ;;  %v1011_v24 = vld [vmem:[%s2416_s4 + $0x150] sm:$0xff] }
 0x441   :  { %v462_v32 = vrot.slane %v461_v30, 1  ;;  %v441_v34 = vrot.slane %v440_v28, 2 }
 0x442   :  { %v456_v33 = vrot.slane %v455_v31, 1  ;;  %v449_v36 = vadd.f32 %v448_v10, %v447_v26  ;;  %v1768_v26 = vpack.c.bf16 %v1011_v24, %v1009_v21 }
 0x443   :  { %v463_v7 = vadd.f32 %v462_v32, %v461_v30  ;;  %v442_v38 = vadd.f32 %v441_v34, %v440_v28  ;;  %v1539_v30 = vld [vmem:[%s2415_s3 + $0x62] ss:$0 sm:$0xff] }
 0x444   :  { %v457_v35 = vadd.f32 %v456_v33, %v455_v31  ;;  %v450_v39 = vrot.slane %v449_v36, 1 }
 0x445   :  { %1852 = vrcp.f32 %v463_v7  ;;  %v443_v40 = vrot.slane %v442_v38, 1 }
 0x446   :  { %1854 = vrcp.f32 %v457_v35  ;;  %v451_v23 = vadd.f32 %v450_v39, %v449_v36  ;;  %v1014_v35 = vld [vmem:[%s2416_s4 + $0x168] sm:$0xff]  ;;  %v1016_v36 = vld [vmem:[%s2416_s4 + $0x178] sm:$0xff]  ;;  %v1013_v39 = vld [vmem:[%s2416_s4 + $0x160] sm:$0xff] }
 0x447   :  { %v444_v43 = vadd.f32 %v443_v40, %v442_v38  ;;  %v1770_v38 = vpack.c.bf16 %v1016_v36, %v1014_v35  ;;  %v1015_v40 = vld [vmem:[%s2416_s4 + $0x170] sm:$0xff] }
 0x44f   :  { %v1853_v42 = vpop.eup %1852 }
 0x450   :  { %v1855_v46 = vpop.eup %1854  ;;  %v467_v47 = vmul.f32 %v1853_v42, %v451_v23  ;;  %v1772_v23 = vpack.c.bf16 %v1015_v40, %v1013_v39  ;;  %v822_v42 = vld [vmem:[%s2416_s4 + $0x98] sm:$0xff] }
 0x451   :  { %v466_v48 = vmul.f32 %v1855_v46, %v444_v43  ;;  %v819_v43 = vld [vmem:[%s2416_s4 + $0x80] sm:$0xff]  ;;  %v1742_v44 = vpack.c.bf16 %v822_v42, %v820_v41  ;;  %v824_v46 = vld [vmem:[%s2416_s4 + $0xa8] sm:$0xff] }
 0x453   :  { %v2130_v52 = vsel %vm284_vm1, %v467_v47, %v466_v48  ;;  %v826_v47 = vld [vmem:[%s2416_s4 + $0xb8] sm:$0xff]  ;;  %v1744_v48 = vpack.c.bf16 %v821_v45, %v819_v43 }
 0x454   :  { %v472_v29 = vadd.f32 %v2130_v52, %v2037_v3  ;;  %1542 = vmatmul.mubr.msk.f32.vlgmr.msra.gmra.mrb[2].mxu1 %vm94_vm0, %v2130_v52 }
 0x455   :  { %1737 = vmatpush1.bf16.msra.mxu1 %v1736_v49  ;;  %812 = vmatprep.mubr.f32.mxu1 %v1901_v37  ;;  %v1746_v49 = vpack.c.bf16 %v826_v47, %v824_v46 }
 0x456   :  { %v480_v54 = vrot.slane %v472_v29, %v1964_v12  ;;  %1739 = vmatprep.subr.bf16.mxu1 %v1738_v50  ;;  %v823_v50 = vld [vmem:[%s2416_s4 + $0xa0] sm:$0xff]  ;;  %v908_v29 = vld [vmem:[%s2416_s4 + $0xd8] sm:$0xff] }
 0x458   :  { %v481_v55 = vcombine.high %v480_v54, %v480_v54  ;;  %v488_v56 = vrot.slane %v480_v54, %v1964_v12  ;;  %v1750_v54 = vpack.c.bf16 %v908_v29, %v906_v51  ;;  %v905_v51 = vld [vmem:[%s2416_s4 + $0xc0] sm:$0xff]  ;;  %v907_v29 = vld [vmem:[%s2416_s4 + $0xd0] sm:$0xff] }
 0x459   :  { %1741 = vmatpush1.bf16.msra.mxu1 %v1740_v53  ;;  %v1748_v53 = vpack.c.bf16 %v825_v25, %v823_v50 }
 0x45a   :  { %v495_v3 = vrot.slane %v481_v55, %v1964_v12  ;;  %v499_v58 = vrot.slane %v488_v56, %v1969_v16  ;;  %1743 = vmatprep.subr.bf16.mxu1 %v1742_v44  ;;  %v1134_v56 = vld [vmem:[%s2417_s5 + $0x40] sm:$0xff] }
 0x45c   :  { %v503_v60 = vrot.slane %v495_v3, %v1969_v16  ;;  %1543 = vmatmul.mubr.msk.f32.vlgmr.msra.gmra.mrb[2].mxu1 %vm94_vm0, %v2033_v2  ;;  %v506_v61 = vadd.f32 %v499_v58, %v2142_v57  ;;  %v1135_v3 = vld [vmem:[%s2417_s5 + $0x48] sm:$0xff] }
 0x45d   :  { %896 = vmatprep.mubr.f32.mxu1 %v1901_v37  ;;  %1745 = vmatpush1.bf16.msra.mxu1 %v1744_v48  ;;  %v1775_v62 = vpack.c.bf16 %v1135_v3, %v1134_v56  ;;  %v912_v56 = vld [vmem:[%s2416_s4 + $0xf8] sm:$0xff] }
 0x45e   :  { %1636 = vmatprep.mubr.msk.f32.mxu0 %vm94_vm0, %v506_v61  ;;  %v507_v12 = vadd.f32 %v503_v60, %v2149_v59  ;;  %1747 = vmatprep.subr.bf16.mxu1 %v1746_v49 }
 0x460   :  { %1637 = vmatmul.mubr.msk.f32.vlgmr.msra.gmra.mrb[4].mxu0 %vm94_vm0, %v507_v12 }
 0x461   :  { %1097 = vmatprep.mubr.f32.mxu0 %v1901_v37  ;;  %1761 = vmatpush1.bf16.msra.mxu0 %v1760_v9 }
 0x462   :  { %1763 = vmatprep.subr.bf16.mxu0 %v1762_v13  ;;  %1749 = vmatpush1.bf16.msra.mxu1 %v1748_v53  ;;  %v1778_v13 = vpack.c.bf16 %v1137_v4, %v1136_v1 }
 0x463   :  { %1751 = vmatprep.subr.bf16.mxu1 %v1750_v54 }
 0x465   :  { %1765 = vmatpush1.bf16.msra.mxu0 %v1764_v19 }
 0x466   :  { %1767 = vmatprep.subr.bf16.mxu0 %v1766_v20 }
 0x469   :  { %1769 = vmatpush1.bf16.msra.mxu0 %v1768_v26 }
 0x46a   :  { %1771 = vmatprep.subr.bf16.mxu0 %v1770_v38 }
 0x46d   :  { %1773 = vmatpush1.bf16.msra.mxu0 %v1772_v23 }
 0x46e   :  { %1774 = vmatprep.subr.bf16.mxu0 %v1902_v22 }
 0x533   :  { %v1638_v27 = vpop.f32.mrb[4].mxu0 }
 0x534   :  { %1856 = vtanh.f32 %v1638_v27  ;;  %v580_v28 = vpop.f32.mrb[5].mxu0 }
 0x535   :  { %1858 = vtanh.f32 %v580_v28 }
 0x53e   :  { %v1857_v31 = vpop.eup %1856 }
 0x53f   :  { %v1859_v32 = vpop.eup %1858  ;;  %v596_v10 = vmul.f32 %v1857_v31, %v1539_v30 }
 0x540   :  { %v595_v33 = vmul.f32 %v1859_v32, %v1539_v30 }
 0x541   :  { %v600_v34 = vsel %vm94_vm0, %v596_v10, 0.0 }
 0x542   :  { %601 = vadd.xlane.f32.xlu1 %v600_v34  ;;  %v597_v7 = vsel %vm94_vm0, %v595_v33, 0.0 }
 0x543   :  { %598 = vadd.xlane.f32.xlu0 %v597_v7 }
 0x559   :  { %1028 = vrot.lane.b32.xlu0 %v1945_v0, %s1903_s11  ;;  %s1905_s11 = smov 32  }
 0x5cf   :  { %v602_v55 = vpop.xlane.xlu1 %601 }
 0x5d0   :  { %v609_v58 = vrot.slane %v602_v55, 4  ;;  %v599_v60 = vpop.xlane.xlu0 %598 }
 0x5d1   :  { %v603_v61 = vrot.slane %v599_v60, 4 }
 0x5d2   :  { %v610_v12 = vmax.f32 %v602_v55, %v609_v58 }
 0x5d3   :  { %v604_v63 = vmax.f32 %v599_v60, %v603_v61  ;;  %v1752_v61 = vpack.c.bf16 %v907_v29, %v905_v51  ;;  %v1130_v51 = vld [vmem:[%s2417_s5 + $0x20] sm:$0xff]  ;;  %v1131_v29 = vld [vmem:[%s2417_s5 + $0x28] sm:$0xff] }
 0x5d4   :  { %v611_v5 = vrot.slane %v610_v12, 2  ;;  %v1029_v6 = vpop.permute.xlu0 %1028 }
 0x5d5   :  { %v605_v8 = vrot.slane %v604_v63, 2  ;;  %1546 = vmatmul.mubr.msk.f32.vlgmr.msra.gmra.mrb[6].mxu0 %vm1030_vm2, %v1029_v6  ;;  %v1284_v6 = vld [vmem:[%s2417_s5 + $0x68] sm:$0xff] }
 0x5d6   :  { %v612_v9 = vmax.f32 %v610_v12, %v611_v5  ;;  %1776 = vmatpush3.bf16.msra.mxu0 %v1775_v62  ;;  %1647 = vmatprep.mubr.msk.f32.mxu0 %vm1904_vm3, %v1901_v37  ;;  %v909_v62 = vld [vmem:[%s2416_s4 + $0xe0] sm:$0xff] }
 0x5d7   :  { %v606_v14 = vmax.f32 %v604_v63, %v605_v8  ;;  %1777 = vmatprep.subr.bf16.mxu0 %v1902_v22  ;;  %v911_v63 = vld [vmem:[%s2416_s4 + $0xf0] sm:$0xff]  ;;  %v1283_v5 = vld [vmem:[%s2417_s5 + $0x60] sm:$0xff] }
 0x5d8   :  { %v613_v15 = vrot.slane %v612_v9, 1  ;;  %v1756_v4 = vpack.c.bf16 %v911_v63, %v909_v62  ;;  %v1793_v8 = vpack.c.bf16 %v1284_v6, %v1283_v5  ;;  %v1435_v6 = vld [vmem:[%s2417_s5 + $0xb0] sm:$0xff] }
 0x5d9   :  { %v607_v17 = vrot.slane %v606_v14, 1 }
 0x5da   :  { %v614_v18 = vmax.f32 %v612_v9, %v613_v15  ;;  %1779 = vmatpush3.bf16.msra.mxu0 %v1778_v13  ;;  %v1285_v9 = vld [vmem:[%s2417_s5 + $0x70] sm:$0xff]  ;;  %v1286_v13 = vld [vmem:[%s2417_s5 + $0x78] sm:$0xff]  ;;  %v1358_v15 = vld [vmem:[%s2417_s5 + $0x80] sm:$0xff] }
 0x5db   :  { %v608_v19 = vmax.f32 %v606_v14, %v607_v17  ;;  %1780 = vmatprep.subr.bf16.mxu0 %v1902_v22  ;;  %v1796_v14 = vpack.c.bf16 %v1286_v13, %v1285_v9  ;;  %v1359_v17 = vld [vmem:[%s2417_s5 + $0x88] sm:$0xff] }
 0x5dc   :  { %v616_v20 = vsub.f32 %v602_v55, %v614_v18  ;;  %v910_v55 = vld [vmem:[%s2416_s4 + $0xe8] sm:$0xff]  ;;  %v1799_v18 = vpack.c.bf16 %v1359_v17, %v1358_v15 }
 0x5dd   :  { %v615_v21 = vsub.f32 %v599_v60, %v608_v19  ;;  %1648 = vmatmul.mubr.msk.f32.vlgmr.msra.gmra.mrb[8].mxu0 %vm94_vm0, %v2033_v2  ;;  %v1754_v12 = vpack.c.bf16 %v912_v56, %v910_v55  ;;  %v1361_v19 = vld [vmem:[%s2417_s5 + $0x98] sm:$0xff]  ;;  %v1874_v56 = vld [vmem:[%s2412_s0] sm:$0x3] }
 0x5de   :  { %v619_v24 = vmul.f32 1.442695, %v616_v20  ;;  %1666 = vmatprep.mubr.msk.f32.mxu0 %vm1904_vm3, %v1901_v37  ;;  %v1133_v55 = vld [vmem:[%s2417_s5 + $0x38] sm:$0xff] }
 0x5df   :  { %v617_v26 = vmul.f32 1.442695, %v615_v21 }
 0x5e0   :  { %1860 = vpow2.f32 %v619_v24 }
 0x5e1   :  { %1862 = vpow2.f32 %v617_v26 }
 0x5ea   :  { %v1861_v27 = vpop.eup %1860 }
 0x5eb   :  { %v1863_v28 = vpop.eup %1862  ;;  %v622_v30 = vmul.f32 %v1861_v27, %v2149_v59  ;;  %v643_v31 = vrot.slane %v1861_v27, 4 }
 0x5ec   :  { %v621_v32 = vmul.f32 %v1863_v28, %v2142_v57  ;;  %v637_v10 = vrot.slane %v1863_v28, 4 }
 0x5ed   :  { %v630_v33 = vsel %vm94_vm0, %v622_v30, 0.0  ;;  %v644_v34 = vadd.f32 %v1861_v27, %v643_v31 }
 0x5ee   :  { %v623_v2 = vsel %vm94_vm0, %v621_v32, 0.0  ;;  %v631_v7 = vrot.slane %v630_v33, 4  ;;  %v638_v35 = vadd.f32 %v1863_v28, %v637_v10  ;;  %v1541_v28 = vld [vmem:[%s2416_s4 + $0x181] ss:$8 sm:$0x3] }
 0x5ef   :  { %v624_v36 = vrot.slane %v623_v2, 4  ;;  %v645_v38 = vrot.slane %v644_v34, 2  ;;  %v1021_v30 = vrot.slane %v1541_v28, %v1969_v16 }
 0x5f0   :  { %v632_v39 = vadd.f32 %v631_v7, %v630_v33  ;;  %v639_v40 = vrot.slane %v638_v35, 2 }
 0x5f1   :  { %v625_v23 = vadd.f32 %v624_v36, %v623_v2  ;;  %v646_v41 = vadd.f32 %v645_v38, %v644_v34 }
 0x5f2   :  { %v640_v42 = vadd.f32 %v639_v40, %v638_v35  ;;  %v633_v59 = vrot.slane %v632_v39, 2 }
 0x5f3   :  { %v647_v43 = vrot.slane %v646_v41, 1  ;;  %v626_v45 = vrot.slane %v625_v23, 2 }
 0x5f4   :  { %v641_v44 = vrot.slane %v640_v42, 1  ;;  %v634_v47 = vadd.f32 %v633_v59, %v632_v39 }
 0x5f5   :  { %v648_v57 = vadd.f32 %v647_v43, %v646_v41  ;;  %v627_v48 = vadd.f32 %v626_v45, %v625_v23  ;;  %v995_v41 = vsub.s32 1, %v1961_v11  ;;  %v1128_v11 = vld [vmem:[%s2417_s5 + $0x10] sm:$0xff] }
 0x5f6   :  { %v642_v46 = vadd.f32 %v641_v44, %v640_v42  ;;  %v635_v49 = vrot.slane %v634_v47, 1 }
 0x5f7   :  { %1864 = vrcp.f32 %v648_v57  ;;  %v628_v50 = vrot.slane %v627_v48, 1  ;;  %v1025_v42 = vrot.slane %v1541_v28, %v995_v41 }
 0x5f8   :  { %1866 = vrcp.f32 %v642_v46  ;;  %v636_v25 = vadd.f32 %v635_v49, %v634_v47  ;;  %v1126_v46 = vld [vmem:[%s2417_s5] sm:$0xff]  ;;  %v1127_v47 = vld [vmem:[%s2417_s5 + $0x8] sm:$0xff]  ;;  %v1129_v49 = vld [vmem:[%s2417_s5 + $0x18] sm:$0xff] }
 0x5f9   :  { %v629_v54 = vadd.f32 %v628_v50, %v627_v48  ;;  %v1781_v48 = vpack.c.bf16 %v1127_v47, %v1126_v46  ;;  %v1784_v50 = vpack.c.bf16 %v1129_v49, %v1128_v11 }
 0x5fb   :  { %1782 = vmatpush3.bf16.msra.mxu0 %v1781_v48 }
 0x5fc   :  { %1783 = vmatprep.subr.bf16.mxu0 %v1902_v22 }
 0x5ff   :  { %1785 = vmatpush3.bf16.msra.mxu0 %v1784_v50 }
 0x600   :  { %1786 = vmatprep.subr.bf16.mxu0 %v1902_v22 }
 0x601   :  { %v1865_v53 = vpop.eup %1864 }
 0x602   :  { %v1867_v3 = vpop.eup %1866  ;;  %v652_v58 = vmul.f32 %v1865_v53, %v636_v25  ;;  %v1787_v53 = vpack.c.bf16 %v1131_v29, %v1130_v51 }
 0x603   :  { %v651_v60 = vmul.f32 %v1867_v3, %v629_v54  ;;  %v1132_v54 = vld [vmem:[%s2417_s5 + $0x30] sm:$0xff] }
 0x604   :  { %1788 = vmatpush3.bf16.msra.mxu0 %v1787_v53  ;;  %v1790_v3 = vpack.c.bf16 %v1133_v55, %v1132_v54 }
 0x605   :  { %v829_v1 = vsel %vm284_vm1, %v652_v58, %v651_v60  ;;  %1789 = vmatprep.subr.bf16.mxu0 %v1902_v22 }
 0x606   :  { %1544 = vmatmul.mubr.msk.f32.vlgmr.msra.gmra.mrb[2].mxu1 %vm94_vm0, %v829_v1 }
 0x607   :  { %1753 = vmatpush1.bf16.msra.mxu1 %v1752_v61  ;;  %979 = vmatprep.mubr.f32.mxu1 %v1901_v37 }
 0x608   :  { %1755 = vmatprep.subr.bf16.mxu1 %v1754_v12  ;;  %1791 = vmatpush3.bf16.msra.mxu0 %v1790_v3 }
 0x609   :  { %1804 = vmatprep.subr.bf16.mxu0 %v1902_v22 }
 0x60b   :  { %1757 = vmatpush1.bf16.msra.mxu1 %v1756_v4  ;;  %v1434_v4 = vld [vmem:[%s2417_s5 + $0xa8] sm:$0xff] }
 0x60c   :  { %1792 = vmatprep.subr.bf16.mxu1 %v1902_v22 }
 0x60e   :  { %1545 = vmatmul.mubr.msk.f32.vlgmr.msra.gmra.mrb[2].mxu1 %vm94_vm0, %v1945_v0  ;;  %v1360_v0 = vld [vmem:[%s2417_s5 + $0x90] sm:$0xff] }
 0x60f   :  { %1794 = vmatpush3.bf16.msra.mxu1 %v1793_v8  ;;  %1677 = vmatprep.mubr.msk.f32.mxu1 %vm1904_vm3, %v1901_v37  ;;  %v1802_v20 = vpack.c.bf16 %v1361_v19, %v1360_v0  ;;  %v1436_v8 = vld [vmem:[%s2417_s5 + $0xb8] sm:$0xff]  ;;  %v1553_v19 = vld [vmem:[%s2417_s5 + $0xc0] ss:$0 sm:$0xff] }
 0x610   :  { %1795 = vmatprep.subr.bf16.mxu1 %v1902_v22  ;;  %v1808_v13 = vpack.c.bf16 %v1436_v8, %v1435_v6 }
 0x613   :  { %1797 = vmatpush3.bf16.msra.mxu1 %v1796_v14 }
 0x614   :  { %1798 = vmatprep.subr.bf16.mxu1 %v1902_v22 }
 0x616   :  { %1678 = vmatmul.mubr.msk.f32.vlgmr.msra.gmra.mrb[4].mxu1 %vm94_vm0, %v2130_v52  ;;  %v1540_v52 = vld [vmem:[%s2416_s4 + $0x180] ss:$8 sm:$0x3]  ;;  %s1906_s4 = smov [#allocation2]  }
 0x617   :  { %1800 = vmatpush3.bf16.msra.mxu1 %v1799_v18  ;;  %1688 = vmatprep.mubr.msk.f32.mxu1 %vm1904_vm3, %v1901_v37  ;;  %v992_v31 = vrot.slane %v1540_v52, %v1969_v16  ;;  %v996_v16 = vrot.slane %v1540_v52, %v995_v41  ;;  %s1521_s19 = sshll.u32 %s1906_s4, 4  ;;  %s1522_s19 = int_to_ptr.vmem [resolvable:$true] %s1521_s19 }
 0x618   :  { %1801 = vmatprep.subr.bf16.mxu1 %v1902_v22  ;;  %s1875_s20 = scalar_lea.vmem %s1522_s19, 32  ;;  %p1880_p1 = scmp.lt.s32.totalorder %s1522_s19, %s1522_s19 }
 0x619   :  { %p1876_p0 = scmp.ne.s32.totalorder %s1522_s19, %s1875_s20  ;;  %p1881_p2 = scmp.lt.s32.totalorder %s1875_s20, %s1875_s20 }
 0x61b   :  { %1803 = vmatpush3.bf16.msra.mxu1 %v1802_v20  ;;  %p1882_p3 = por %p1881_p2, %p1880_p1 }
 0x61d   :  { %p1883_p4 = pnand %p1882_p3, %p1876_p0 }
 0x61e   :  { %1689 = vmatmul.mubr.msk.f32.vlgmr.msra.gmra.mrb[6].mxu1 %vm94_vm0, %v829_v1  ;;  %v1433_v1 = vld [vmem:[%s2417_s5 + $0xa0] sm:$0xff] }
 0x61f   :  { %v1805_v5 = vpack.c.bf16 %v1434_v4, %v1433_v1 }
 0x6a8   :  { %v1099_v21 = vpop.f32.mrb[6].mxu0 }
 0x6a9   :  { %v1101_v24 = vpop.f32.mrb[7].mxu0  ;;  %v1100_v32 = vadd.f32 %v1099_v21, %v1021_v30 }
 0x6aa   :  { %v1102_v43 = vadd.f32 %v1101_v24, %v1025_v42 }
 0x6b0   :  { %v2328_v26 = vpop.f32.mrb[8].mxu0 }
 0x6b1   :  { %v1649_v27 = vpop.f32.mrb[9].mxu0 }
 0x6e1   :  { %v981_v10 = vpop.f32.mrb[2].mxu1 }
 0x6e2   :  { %v999_v33 = vadd.f32 %v992_v31, %v981_v10  ;;  %v983_v34 = vpop.f32.mrb[3].mxu1 }
 0x6e3   :  { %v1000_v44 = vadd.f32 %v996_v16, %v983_v34 }
 0x6e4   :  { %v1104_v2 = vadd.f32 %v1100_v32, %v999_v33 }
 0x6e6   :  { %v1547_v7 = vmul.f32 -1.442695, %v1104_v2 }
 0x6e8   :  { %1868 = vpow2.f32 %v1547_v7 }
 0x6e9   :  { %v2338_v35 = vpop.f32.mrb[4].mxu1 }
 0x6ea   :  { %v1679_v36 = vpop.f32.mrb[5].mxu1 }
 0x6f1   :  { %v2340_v38 = vpop.f32.mrb[6].mxu1 }
 0x6f2   :  { %v1869_v39 = vpop.eup %1868  ;;  %v1690_v40 = vpop.f32.mrb[7].mxu1 }
 0x6f3   :  { %v1108_v23 = vadd.f32 1.0, %v1869_v39 }
 0x6f5   :  { %1870 = vrcp.f32 %v1108_v23 }
 0x6ff   :  { %v1871_v59 = vpop.eup %1870 }
 0x700   :  { %v1111_v45 = vmul.f32 %v1871_v59, %v1102_v43  ;;  %v1114_v60 = vsub.f32 1.0, %v1871_v59 }
 0x702   :  { %v1112_v57 = vadd.f32 %v1111_v45, %v1000_v44 }
 0x704   :  { %1872 = vtanh.f32 %v1112_v57 }
 0x70e   :  { %v1873_v25 = vpop.eup %1872 }
 0x70f   :  { %1116 = vrot.lane.b32.xlu1 %v1873_v25, %s1899_s25 }
 0x713   :  { %1120 = vrot.lane.b32.xlu1 %v1874_v56, %s1905_s11 }
 0x781   :  { %v1117_v58 = vpop.permute.xlu1 %1116 }
 0x782   :  { %v1119_v12 = vmul.f32 %v1117_v58, %v1114_v60 }
 0x785   :  { %v1121_v61 = vpop.permute.xlu1 %1120 }
 0x786   :  { %v1123_v62 = vmul.f32 %v1871_v59, %v1121_v61 }
 0x788   :  { %v1124_v63 = vadd.f32 %v1123_v62, %v1119_v12 }
 0x78a   :  { %1209 = vrot.lane.b32.xlu0 %v1124_v63, %s1899_s25 }
 0x7fc   :  { %v1210_v9 = vpop.permute.xlu0 %1209 }
 0x7fd   :  { %1667 = vmatmul.mubr.msk.f32.vlgmr.msra.gmra.mrb[10].mxu0 %vm1030_vm2, %v1210_v9 }
 0x7fe   :  { %1806 = vmatpush3.bf16.msra.mxu0 %v1805_v5  ;;  %1699 = vmatprep.mubr.msk.f32.mxu0 %vm1904_vm3, %v1901_v37 }
 0x7ff   :  { %1807 = vmatprep.subr.bf16.mxu0 %v1902_v22 }
 0x802   :  { %1809 = vmatpush3.bf16.msra.mxu0 %v1808_v13 }
 0x805   :  { %1700 = vmatmul.mubr.msk.f32.vlgmr.msra.gmra.mrb[12].mxu0 %vm94_vm0, %v1874_v56 }
 0x8d0   :  { %v1279_v14 = vpop.f32.mrb[10].mxu0 }
 0x8d1   :  { %v1280_v15 = vadd.f32 %v1279_v14, %v2328_v26  ;;  %v1668_v17 = vpop.f32.mrb[11].mxu0 }
 0x8d3   :  { %v1357_v18 = vadd.f32 %v2338_v35, %v1280_v15 }
 0x8d5   :  { %v1432_v0 = vadd.f32 %v2340_v38, %v1357_v18 }
 0x8d8   :  { %v1503_v20 = vpop.f32.mrb[12].mxu0 }
 0x8d9   :  { %v1507_v21 = vadd.f32 %v1503_v20, %v1432_v0  ;;  %v1701_v37 = vpop.f32.mrb[13].mxu0 }
 0x8db   :  { %v1512_v22 = vadd.f32 %v1553_v19, %v1507_v21 }
 0x8dd   :  { %v1513_v24 = vsel %vm1030_vm2, %v1512_v22, %v1124_v63 }
 0x8de   :  { %1514 = vst [vmem:[#allocation2] sm:$0x3] %v1513_v24 }
 0x8df   :  { %1886 = shalt.err (!%p1883_p4)
}
 0x8e0   :  { %s1887_s5 = scalar_lea.hbm %s2418_s6, 32 }
 0x8e1   :  { %p1888_p5 = scmp.ne.s32.totalorder %s2418_s6, %s1887_s5  ;;  %p1891_p6 = scmp.lt.u32.totalorder %s1887_s5, %s2418_s6 }
 0x8e3   :  { %p1893_p7 = pnand %p1891_p6, %p1888_p5 }
 0x8e5   :  { %1896 = shalt.err (!%p1893_p7)
}
 0x8e6   :  { %1524 = dma.vmem_to_hbm [thread:$0]  %s1522_s19, 32, %s2418_s6, [#allocation3]  }
 0x8e7   :  { %1897 = dma.done.wait [#allocation3], 32  }
 0x8e8   :  { %1898 = vsyncadd [#allocation3], 4294967264 }
 0x8e9   :  { %1528 = vsyncpa [#allocation3], 1 }

</bundles_post_ra>
